<compile_context>
chip_gen: v7x
topology: tpu7x:2x2x1
jax: 0.10.0
libtpu: 0.0.40
codegen_flags: <defaults>
</compile_context>

<pallas_src>
import jax
import jax.numpy as jnp
from jax import lax
from jax.experimental import pallas as pl
from jax.experimental.pallas import tpu as pltpu


def _round_up(n, m):
    return ((n + m - 1) // m) * m


def gru_last_hidden_kernel(x_ref, wi_ref, wh_ref, bi_ref, bhn_ref, out_ref, gx_ref):
    """Packed-gate GRU; writes the final hidden state h_T.

    x_ref:   (T*Bp, D)   time-major flattened input (row = t*Bp + b), matmul dtype
    wi_ref:  (D, Gp)     packed [W_ir^T | W_iz^T | W_in^T | 0pad], Gp = roundup(3H,128)
    wh_ref:  (H, Gp)     packed [W_hr^T | W_hz^T | W_hn^T | 0pad]
    bi_ref:  (1, Gp)     packed f32 bias [b_ir+b_hr | b_iz+b_hz | b_in | 0]
    bhn_ref: (1, H)      f32 b_hn (gated by r, cannot be folded)
    out_ref: (Bp, H)     f32 final hidden state h_T (batch padded to 8 sublanes)
    gx_ref:  (T*Bp, Gp)  f32 VMEM scratch: precomputed input projections
    """
    TB, _ = x_ref.shape
    Bp, H = out_ref.shape
    T = TB // Bp

    # Prologue: ONE MXU matmul projects every timestep through the packed input
    # weights; folded biases (incl. b_hr/b_hz) added once, not per step.
    gx_ref[...] = (
        jnp.dot(x_ref[...], wi_ref[...], preferred_element_type=jnp.float32)
        + bi_ref[...]
    )

    bhn = bhn_ref[...]  # (1, H) f32, tiny -> fine to keep live

    # ---- Peeled t = 0 step: h0 == 0, so no recurrence matmul is needed. ----
    gx0 = gx_ref[pl.ds(0, Bp), :]                      # (Bp, Gp) f32
    r0 = jax.nn.sigmoid(gx0[:, 0:H])
    z0 = jax.nn.sigmoid(gx0[:, H:2 * H])
    n0 = jnp.tanh(gx0[:, 2 * H:3 * H] + r0 * bhn)
    h1 = n0 - z0 * n0                                  # == (1 - z0) * n0  (h0 = 0)

    # ---- Remaining T-1 steps: one (Bp,H) @ (H,Gp) MXU pass per step. ----
    def step(t, h):
        row = pl.multiple_of(t * Bp, Bp)
        gx_t = gx_ref[pl.ds(row, Bp), :]               # (Bp, Gp) cheap VMEM load
        wh = wh_ref[...]                               # reload per step: 2-4 vregs,
        #                                              # hidden under MXU latency
        gh = jnp.dot(h.astype(wh.dtype), wh,
                     preferred_element_type=jnp.float32)   # (Bp, Gp), single MXU tile
        pre = gx_t + gh
        r = jax.nn.sigmoid(pre[:, 0:H])
        z = jax.nn.sigmoid(pre[:, H:2 * H])
        n = jnp.tanh(gx_t[:, 2 * H:3 * H] + r * (gh[:, 2 * H:3 * H] + bhn))
        return n + z * (h - n)                         # == (1-z)*n + z*h, one fewer VALU op

    # T is small & static: fully unroll so the LLO scheduler sees the chain.
    h_last = lax.fori_loop(1, T, step, h1, unroll=True)
    out_ref[...] = h_last


def fuse_params(params, in_dim, num_hid, matmul_dtype=jnp.float32):
    """Pack per-gate weights into single 128-lane-aligned blocks.

    Gate columns: [0:H]=r, [H:2H]=z, [2H:3H]=n, [3H:Gp]=zero padding. Zero
    padding + h0=0 keeps the padded gate lanes irrelevant (never read).
    b_hr/b_hz fold into bi; b_hn stays separate because it is gated by r.
    """
    H, D = num_hid, in_dim
    assert H % 8 == 0  # TODO(synk): pad hidden rows to a multiple of 8 for odd sizes
    Gp = _round_up(3 * H, 128)

    wi = jnp.zeros((D, Gp), jnp.float32)
    wi = wi.at[:, 0:H].set(params["wir"])
    wi = wi.at[:, H:2 * H].set(params["wiz"])
    wi = wi.at[:, 2 * H:3 * H].set(params["win"])

    wh = jnp.zeros((H, Gp), jnp.float32)
    wh = wh.at[:, 0:H].set(params["whr"])
    wh = wh.at[:, H:2 * H].set(params["whz"])
    wh = wh.at[:, 2 * H:3 * H].set(params["whn"])

    bi = jnp.zeros((1, Gp), jnp.float32)
    bi = bi.at[:, 0:H].set(params["bir"] + params["bhr"])       # b_hr folded
    bi = bi.at[:, H:2 * H].set(params["biz"] + params["bhz"])   # b_hz folded
    bi = bi.at[:, 2 * H:3 * H].set(params["bin"])               # b_hn NOT folded

    bhn = params["bhn"].astype(jnp.float32)                      # (1, H)

    return dict(
        wi=wi.astype(matmul_dtype),   # matmul operands may be bf16 (f32 accumulate)
        wh=wh.astype(matmul_dtype),
        bi=bi,                        # biases / gate math stay f32 (v5e-safe)
        bhn=bhn,
    )


@jax.jit
def question_embedding_forward(x, fused):
    """x: (batch, seq, in_dim) float32. Returns (batch, num_hid) float32."""
    B, T, D = x.shape
    H = fused["bhn"].shape[1]
    Gp = fused["wi"].shape[1]
    Bp = _round_up(B, 8)

    # Time-major, batch padded to 8 sublanes, pre-flattened so the kernel never
    # reshapes a live value; row index = t*Bp + b. Cast to the matmul dtype.
    x_tm = jnp.transpose(x, (1, 0, 2))                 # (T, B, D)
    if Bp != B:
        x_tm = jnp.pad(x_tm, ((0, 0), (0, Bp - B), (0, 0)))
    x_flat = x_tm.reshape(T * Bp, D).astype(fused["wi"].dtype)

    itemsize = jnp.dtype(fused["wi"].dtype).itemsize
    cost = pl.CostEstimate(
        flops=2 * T * Bp * Gp * (D + H),
        transcendentals=3 * T * Bp * H,
        bytes_accessed=(x_flat.size * itemsize
                        + (fused["wi"].size + fused["wh"].size) * itemsize
                        + (fused["bi"].size + fused["bhn"].size) * 4
                        + Bp * H * 4),
    )

    vmem = pl.BlockSpec(memory_space=pltpu.MemorySpace.VMEM)
    out = pl.pallas_call(
        gru_last_hidden_kernel,
        out_shape=jax.ShapeDtypeStruct((Bp, H), jnp.float32),
        in_specs=[vmem] * 5,
        out_specs=vmem,
        scratch_shapes=[pltpu.VMEM((T * Bp, Gp), jnp.float32)],
        cost_estimate=cost,
    )(x_flat, fused["wi"], fused["wh"], fused["bi"], fused["bhn"])
    return out[:B, :]


def make_params(key, in_dim, num_hid):
    """Deterministic PyTorch-style GRU init: U(-1/sqrt(H), 1/sqrt(H)).

    PyTorch stores weight_ih_l0 as (3H, D) with gate row order [r; z; n];
    we split per gate and transpose so the kernel does x @ W^T directly.
    """
    H, D = num_hid, in_dim
    k = 1.0 / jnp.sqrt(jnp.float32(H))
    keys = jax.random.split(key, 4)
    w_ih = jax.random.uniform(keys[0], (3 * H, D), jnp.float32, -k, k)
    w_hh = jax.random.uniform(keys[1], (3 * H, H), jnp.float32, -k, k)
    b_ih = jax.random.uniform(keys[2], (3 * H,), jnp.float32, -k, k)
    b_hh = jax.random.uniform(keys[3], (3 * H,), jnp.float32, -k, k)

    def gate(w, i):
        return w[i * H:(i + 1) * H]

    return dict(
        wir=gate(w_ih, 0).T, wiz=gate(w_ih, 1).T, win=gate(w_ih, 2).T,
        whr=gate(w_hh, 0).T, whz=gate(w_hh, 1).T, whn=gate(w_hh, 2).T,
        bir=gate(b_ih, 0).reshape(1, H), biz=gate(b_ih, 1).reshape(1, H),
        bin=gate(b_ih, 2).reshape(1, H),
        bhr=gate(b_hh, 0).reshape(1, H), bhz=gate(b_hh, 1).reshape(1, H),
        bhn=gate(b_hh, 2).reshape(1, H),
    )


def reference_forward(x, params):
    """Pure-JAX GRU reference (same equations) for correctness checking."""
    B, T, D = x.shape
    H = params["whr"].shape[0]
    h0 = jnp.zeros((B, H), jnp.float32)

    def step(h, x_t):
        r = jax.nn.sigmoid(x_t @ params["wir"] + params["bir"]
                           + h @ params["whr"] + params["bhr"])
        z = jax.nn.sigmoid(x_t @ params["wiz"] + params["biz"]
                           + h @ params["whz"] + params["bhz"])
        n = jnp.tanh(x_t @ params["win"] + params["bin"]
                     + r * (h @ params["whn"] + params["bhn"]))
        h_new = (1.0 - z) * n + z * h
        return h_new, None

    h_last, _ = lax.scan(step, h0, jnp.transpose(x, (1, 0, 2)))
    return h_last


if __name__ == "__main__":
    # Module config: QuestionEmbedding(in_dim=32, num_hid=32, nlayers=1,
    #                                  bidirect=False, dropout=0.0, rnn_type='GRU')
    # TODO(synk): bidirectional / multi-layer / LSTM variants not implemented
    # (ndirections==1 GRU path only, matching the tested config).
    batch, seq, in_dim, num_hid = 2, 8, 32, 32

    key = jax.random.PRNGKey(0)
    kx, kp = jax.random.split(key)
    x = jax.random.normal(kx, (batch, seq, in_dim), jnp.float32)
    params = make_params(kp, in_dim, num_hid)
    ref = reference_forward(x, params)

    # f32 matmul operands: bit-tight correctness check.
    fused_f32 = fuse_params(params, in_dim, num_hid, jnp.float32)
    out_f32 = jax.block_until_ready(question_embedding_forward(x, fused_f32))
    assert out_f32.shape == (batch, num_hid)
    assert jnp.allclose(out_f32, ref, atol=1e-5, rtol=1e-5), "f32 mismatch vs reference GRU"

    # bf16 matmul operands (MXU-native on v6e/v7x; f32 accumulate + f32 gate math).
    fused_bf16 = fuse_params(params, in_dim, num_hid, jnp.bfloat16)
    out_bf16 = jax.block_until_ready(question_embedding_forward(x, fused_bf16))
    assert jnp.allclose(out_bf16, ref, atol=3e-2, rtol=3e-2), "bf16 mismatch vs reference GRU"

    print("KERNEL_OK")
</pallas_src>

<mosaic_0001>
module attributes {stable_mosaic.version = 11 : i64} {
  func.func @gru_last_hidden_kernel(%arg0: memref<64x32xf32, #tpu.memory_space<vmem>>, %arg1: memref<32x128xf32, #tpu.memory_space<vmem>>, %arg2: memref<32x128xf32, #tpu.memory_space<vmem>>, %arg3: memref<1x128xf32, #tpu.memory_space<vmem>>, %arg4: memref<1x32xf32, #tpu.memory_space<vmem>>, %arg5: memref<8x32xf32, #tpu.memory_space<vmem>>, %arg6: memref<64x128xf32, #tpu.memory_space<vmem>>) attributes {dimension_semantics = [], scalar_prefetch = 0 : i64, scratch_operands = 1 : i64, tpu.core_type = #tpu.core_type<tc>} {
    %c0 = arith.constant 0 : index
    %c0_0 = arith.constant 0 : index
    %0 = vector.load %arg0[%c0, %c0_0] : memref<64x32xf32, #tpu.memory_space<vmem>>, vector<64x32xf32>
    %c0_1 = arith.constant 0 : index
    %c0_2 = arith.constant 0 : index
    %1 = vector.load %arg1[%c0_1, %c0_2] : memref<32x128xf32, #tpu.memory_space<vmem>>, vector<32x128xf32>
    %cst = arith.constant dense<0.000000e+00> : vector<64x128xf32>
    %2 = tpu.matmul %0, %1, %cst {dimension_numbers = #tpu.dot_dimension_numbers<[1], [0], [0], [1], [0, 0, 1, 1], [], []>} : vector<64x32xf32>, vector<32x128xf32>, vector<64x128xf32> -> vector<64x128xf32>
    %c0_3 = arith.constant 0 : index
    %c0_4 = arith.constant 0 : index
    %3 = vector.load %arg3[%c0_3, %c0_4] : memref<1x128xf32, #tpu.memory_space<vmem>>, vector<1x128xf32>
    %4 = vector.broadcast %3 : vector<1x128xf32> to vector<64x128xf32>
    %5 = arith.addf %2, %4 : vector<64x128xf32>
    %c0_5 = arith.constant 0 : index
    %c0_6 = arith.constant 0 : index
    %6 = vector.load %arg6[%c0_5, %c0_6] : memref<64x128xf32, #tpu.memory_space<vmem>>, vector<64x128xf32>
    tpu.vector_store %arg6[%c0_5, %c0_6], %5 {strides = array<i32>} : memref<64x128xf32, #tpu.memory_space<vmem>>, vector<64x128xf32>,
    %c0_7 = arith.constant 0 : index
    %c0_8 = arith.constant 0 : index
    %7 = vector.load %arg4[%c0_7, %c0_8] : memref<1x32xf32, #tpu.memory_space<vmem>>, vector<1x32xf32>
    %c0_9 = arith.constant 0 : index
    %c0_10 = arith.constant 0 : index
    %8 = vector.load %arg6[%c0_9, %c0_10] : memref<64x128xf32, #tpu.memory_space<vmem>>, vector<8x128xf32>
    %9 = vector.extract_strided_slice %8 {offsets = [0, 0], sizes = [8, 32], strides = [1, 1]} : vector<8x128xf32> to vector<8x32xf32>
    %10 = arith.negf %9 : vector<8x32xf32>
    %11 = math.exp %10 : vector<8x32xf32>
    %cst_11 = arith.constant 1.000000e+00 : f32
    %12 = vector.broadcast %cst_11 : f32 to vector<8x32xf32>
    %13 = arith.addf %12, %11 : vector<8x32xf32>
    %14 = arith.divf %12, %13 : vector<8x32xf32>
    %15 = vector.extract_strided_slice %8 {offsets = [0, 32], sizes = [8, 32], strides = [1, 1]} : vector<8x128xf32> to vector<8x32xf32>
    %16 = arith.negf %15 : vector<8x32xf32>
    %17 = math.exp %16 : vector<8x32xf32>
    %cst_12 = arith.constant 1.000000e+00 : f32
    %18 = vector.broadcast %cst_12 : f32 to vector<8x32xf32>
    %19 = arith.addf %18, %17 : vector<8x32xf32>
    %20 = arith.divf %18, %19 : vector<8x32xf32>
    %21 = vector.extract_strided_slice %8 {offsets = [0, 64], sizes = [8, 32], strides = [1, 1]} : vector<8x128xf32> to vector<8x32xf32>
    %22 = vector.broadcast %7 : vector<1x32xf32> to vector<8x32xf32>
    %23 = arith.mulf %14, %22 : vector<8x32xf32>
    %24 = arith.addf %21, %23 : vector<8x32xf32>
    %25 = math.tanh %24 : vector<8x32xf32>
    %26 = arith.mulf %20, %25 : vector<8x32xf32>
    %27 = arith.subf %25, %26 : vector<8x32xf32>
    %c1_i32 = arith.constant 1 : i32
    %c8_i32 = arith.constant 8 : i32
    %28 = arith.muli %c1_i32, %c8_i32 : i32
    %29 = tpu.assume_multiple %28, 8 : i32
    %30 = arith.index_cast %29 : i32 to index
    %c0_13 = arith.constant 0 : index
    %31 = vector.load %arg6[%30, %c0_13] : memref<64x128xf32, #tpu.memory_space<vmem>>, vector<8x128xf32>
    %c0_14 = arith.constant 0 : index
    %c0_15 = arith.constant 0 : index
    %32 = vector.load %arg2[%c0_14, %c0_15] : memref<32x128xf32, #tpu.memory_space<vmem>>, vector<32x128xf32>
    %cst_16 = arith.constant dense<0.000000e+00> : vector<8x128xf32>
    %33 = tpu.matmul %27, %32, %cst_16 {dimension_numbers = #tpu.dot_dimension_numbers<[1], [0], [0], [1], [0, 0, 1, 1], [], []>} : vector<8x32xf32>, vector<32x128xf32>, vector<8x128xf32> -> vector<8x128xf32>
    %34 = arith.addf %31, %33 : vector<8x128xf32>
    %35 = vector.extract_strided_slice %34 {offsets = [0, 0], sizes = [8, 32], strides = [1, 1]} : vector<8x128xf32> to vector<8x32xf32>
    %36 = arith.negf %35 : vector<8x32xf32>
    %37 = math.exp %36 : vector<8x32xf32>
    %cst_17 = arith.constant 1.000000e+00 : f32
    %38 = vector.broadcast %cst_17 : f32 to vector<8x32xf32>
    %39 = arith.addf %38, %37 : vector<8x32xf32>
    %40 = arith.divf %38, %39 : vector<8x32xf32>
    %41 = vector.extract_strided_slice %34 {offsets = [0, 32], sizes = [8, 32], strides = [1, 1]} : vector<8x128xf32> to vector<8x32xf32>
    %42 = arith.negf %41 : vector<8x32xf32>
    %43 = math.exp %42 : vector<8x32xf32>
    %cst_18 = arith.constant 1.000000e+00 : f32
    %44 = vector.broadcast %cst_18 : f32 to vector<8x32xf32>
    %45 = arith.addf %44, %43 : vector<8x32xf32>
    %46 = arith.divf %44, %45 : vector<8x32xf32>
    %47 = vector.extract_strided_slice %31 {offsets = [0, 64], sizes = [8, 32], strides = [1, 1]} : vector<8x128xf32> to vector<8x32xf32>
    %48 = vector.extract_strided_slice %33 {offsets = [0, 64], sizes = [8, 32], strides = [1, 1]} : vector<8x128xf32> to vector<8x32xf32>
    %49 = vector.broadcast %7 : vector<1x32xf32> to vector<8x32xf32>
    %50 = arith.addf %48, %49 : vector<8x32xf32>
    %51 = arith.mulf %40, %50 : vector<8x32xf32>
    %52 = arith.addf %47, %51 : vector<8x32xf32>
    %53 = math.tanh %52 : vector<8x32xf32>
    %54 = arith.subf %27, %53 : vector<8x32xf32>
    %55 = arith.mulf %46, %54 : vector<8x32xf32>
    %56 = arith.addf %53, %55 : vector<8x32xf32>
    %c2_i32 = arith.constant 2 : i32
    %c8_i32_19 = arith.constant 8 : i32
    %57 = arith.muli %c2_i32, %c8_i32_19 : i32
    %58 = tpu.assume_multiple %57, 8 : i32
    %59 = arith.index_cast %58 : i32 to index
    %c0_20 = arith.constant 0 : index
    %60 = vector.load %arg6[%59, %c0_20] : memref<64x128xf32, #tpu.memory_space<vmem>>, vector<8x128xf32>
    %c0_21 = arith.constant 0 : index
    %c0_22 = arith.constant 0 : index
    %61 = vector.load %arg2[%c0_21, %c0_22] : memref<32x128xf32, #tpu.memory_space<vmem>>, vector<32x128xf32>
    %cst_23 = arith.constant dense<0.000000e+00> : vector<8x128xf32>
    %62 = tpu.matmul %56, %61, %cst_23 {dimension_numbers = #tpu.dot_dimension_numbers<[1], [0], [0], [1], [0, 0, 1, 1], [], []>} : vector<8x32xf32>, vector<32x128xf32>, vector<8x128xf32> -> vector<8x128xf32>
    %63 = arith.addf %60, %62 : vector<8x128xf32>
    %64 = vector.extract_strided_slice %63 {offsets = [0, 0], sizes = [8, 32], strides = [1, 1]} : vector<8x128xf32> to vector<8x32xf32>
    %65 = arith.negf %64 : vector<8x32xf32>
    %66 = math.exp %65 : vector<8x32xf32>
    %cst_24 = arith.constant 1.000000e+00 : f32
    %67 = vector.broadcast %cst_24 : f32 to vector<8x32xf32>
    %68 = arith.addf %67, %66 : vector<8x32xf32>
    %69 = arith.divf %67, %68 : vector<8x32xf32>
    %70 = vector.extract_strided_slice %63 {offsets = [0, 32], sizes = [8, 32], strides = [1, 1]} : vector<8x128xf32> to vector<8x32xf32>
    %71 = arith.negf %70 : vector<8x32xf32>
    %72 = math.exp %71 : vector<8x32xf32>
    %cst_25 = arith.constant 1.000000e+00 : f32
    %73 = vector.broadcast %cst_25 : f32 to vector<8x32xf32>
    %74 = arith.addf %73, %72 : vector<8x32xf32>
    %75 = arith.divf %73, %74 : vector<8x32xf32>
    %76 = vector.extract_strided_slice %60 {offsets = [0, 64], sizes = [8, 32], strides = [1, 1]} : vector<8x128xf32> to vector<8x32xf32>
    %77 = vector.extract_strided_slice %62 {offsets = [0, 64], sizes = [8, 32], strides = [1, 1]} : vector<8x128xf32> to vector<8x32xf32>
    %78 = vector.broadcast %7 : vector<1x32xf32> to vector<8x32xf32>
    %79 = arith.addf %77, %78 : vector<8x32xf32>
    %80 = arith.mulf %69, %79 : vector<8x32xf32>
    %81 = arith.addf %76, %80 : vector<8x32xf32>
    %82 = math.tanh %81 : vector<8x32xf32>
    %83 = arith.subf %56, %82 : vector<8x32xf32>
    %84 = arith.mulf %75, %83 : vector<8x32xf32>
    %85 = arith.addf %82, %84 : vector<8x32xf32>
    %c3_i32 = arith.constant 3 : i32
    %c8_i32_26 = arith.constant 8 : i32
    %86 = arith.muli %c3_i32, %c8_i32_26 : i32
    %87 = tpu.assume_multiple %86, 8 : i32
    %88 = arith.index_cast %87 : i32 to index
    %c0_27 = arith.constant 0 : index
    %89 = vector.load %arg6[%88, %c0_27] : memref<64x128xf32, #tpu.memory_space<vmem>>, vector<8x128xf32>
    %c0_28 = arith.constant 0 : index
    %c0_29 = arith.constant 0 : index
    %90 = vector.load %arg2[%c0_28, %c0_29] : memref<32x128xf32, #tpu.memory_space<vmem>>, vector<32x128xf32>
    %cst_30 = arith.constant dense<0.000000e+00> : vector<8x128xf32>
    %91 = tpu.matmul %85, %90, %cst_30 {dimension_numbers = #tpu.dot_dimension_numbers<[1], [0], [0], [1], [0, 0, 1, 1], [], []>} : vector<8x32xf32>, vector<32x128xf32>, vector<8x128xf32> -> vector<8x128xf32>
    %92 = arith.addf %89, %91 : vector<8x128xf32>
    %93 = vector.extract_strided_slice %92 {offsets = [0, 0], sizes = [8, 32], strides = [1, 1]} : vector<8x128xf32> to vector<8x32xf32>
    %94 = arith.negf %93 : vector<8x32xf32>
    %95 = math.exp %94 : vector<8x32xf32>
    %cst_31 = arith.constant 1.000000e+00 : f32
    %96 = vector.broadcast %cst_31 : f32 to vector<8x32xf32>
    %97 = arith.addf %96, %95 : vector<8x32xf32>
    %98 = arith.divf %96, %97 : vector<8x32xf32>
    %99 = vector.extract_strided_slice %92 {offsets = [0, 32], sizes = [8, 32], strides = [1, 1]} : vector<8x128xf32> to vector<8x32xf32>
    %100 = arith.negf %99 : vector<8x32xf32>
    %101 = math.exp %100 : vector<8x32xf32>
    %cst_32 = arith.constant 1.000000e+00 : f32
    %102 = vector.broadcast %cst_32 : f32 to vector<8x32xf32>
    %103 = arith.addf %102, %101 : vector<8x32xf32>
    %104 = arith.divf %102, %103 : vector<8x32xf32>
    %105 = vector.extract_strided_slice %89 {offsets = [0, 64], sizes = [8, 32], strides = [1, 1]} : vector<8x128xf32> to vector<8x32xf32>
    %106 = vector.extract_strided_slice %91 {offsets = [0, 64], sizes = [8, 32], strides = [1, 1]} : vector<8x128xf32> to vector<8x32xf32>
    %107 = vector.broadcast %7 : vector<1x32xf32> to vector<8x32xf32>
    %108 = arith.addf %106, %107 : vector<8x32xf32>
    %109 = arith.mulf %98, %108 : vector<8x32xf32>
    %110 = arith.addf %105, %109 : vector<8x32xf32>
    %111 = math.tanh %110 : vector<8x32xf32>
    %112 = arith.subf %85, %111 : vector<8x32xf32>
    %113 = arith.mulf %104, %112 : vector<8x32xf32>
    %114 = arith.addf %111, %113 : vector<8x32xf32>
    %c4_i32 = arith.constant 4 : i32
    %c8_i32_33 = arith.constant 8 : i32
    %115 = arith.muli %c4_i32, %c8_i32_33 : i32
    %116 = tpu.assume_multiple %115, 8 : i32
    %117 = arith.index_cast %116 : i32 to index
    %c0_34 = arith.constant 0 : index
    %118 = vector.load %arg6[%117, %c0_34] : memref<64x128xf32, #tpu.memory_space<vmem>>, vector<8x128xf32>
    %c0_35 = arith.constant 0 : index
    %c0_36 = arith.constant 0 : index
    %119 = vector.load %arg2[%c0_35, %c0_36] : memref<32x128xf32, #tpu.memory_space<vmem>>, vector<32x128xf32>
    %cst_37 = arith.constant dense<0.000000e+00> : vector<8x128xf32>
    %120 = tpu.matmul %114, %119, %cst_37 {dimension_numbers = #tpu.dot_dimension_numbers<[1], [0], [0], [1], [0, 0, 1, 1], [], []>} : vector<8x32xf32>, vector<32x128xf32>, vector<8x128xf32> -> vector<8x128xf32>
    %121 = arith.addf %118, %120 : vector<8x128xf32>
    %122 = vector.extract_strided_slice %121 {offsets = [0, 0], sizes = [8, 32], strides = [1, 1]} : vector<8x128xf32> to vector<8x32xf32>
    %123 = arith.negf %122 : vector<8x32xf32>
    %124 = math.exp %123 : vector<8x32xf32>
    %cst_38 = arith.constant 1.000000e+00 : f32
    %125 = vector.broadcast %cst_38 : f32 to vector<8x32xf32>
    %126 = arith.addf %125, %124 : vector<8x32xf32>
    %127 = arith.divf %125, %126 : vector<8x32xf32>
    %128 = vector.extract_strided_slice %121 {offsets = [0, 32], sizes = [8, 32], strides = [1, 1]} : vector<8x128xf32> to vector<8x32xf32>
    %129 = arith.negf %128 : vector<8x32xf32>
    %130 = math.exp %129 : vector<8x32xf32>
    %cst_39 = arith.constant 1.000000e+00 : f32
    %131 = vector.broadcast %cst_39 : f32 to vector<8x32xf32>
    %132 = arith.addf %131, %130 : vector<8x32xf32>
    %133 = arith.divf %131, %132 : vector<8x32xf32>
    %134 = vector.extract_strided_slice %118 {offsets = [0, 64], sizes = [8, 32], strides = [1, 1]} : vector<8x128xf32> to vector<8x32xf32>
    %135 = vector.extract_strided_slice %120 {offsets = [0, 64], sizes = [8, 32], strides = [1, 1]} : vector<8x128xf32> to vector<8x32xf32>
    %136 = vector.broadcast %7 : vector<1x32xf32> to vector<8x32xf32>
    %137 = arith.addf %135, %136 : vector<8x32xf32>
    %138 = arith.mulf %127, %137 : vector<8x32xf32>
    %139 = arith.addf %134, %138 : vector<8x32xf32>
    %140 = math.tanh %139 : vector<8x32xf32>
    %141 = arith.subf %114, %140 : vector<8x32xf32>
    %142 = arith.mulf %133, %141 : vector<8x32xf32>
    %143 = arith.addf %140, %142 : vector<8x32xf32>
    %c5_i32 = arith.constant 5 : i32
    %c8_i32_40 = arith.constant 8 : i32
    %144 = arith.muli %c5_i32, %c8_i32_40 : i32
    %145 = tpu.assume_multiple %144, 8 : i32
    %146 = arith.index_cast %145 : i32 to index
    %c0_41 = arith.constant 0 : index
    %147 = vector.load %arg6[%146, %c0_41] : memref<64x128xf32, #tpu.memory_space<vmem>>, vector<8x128xf32>
    %c0_42 = arith.constant 0 : index
    %c0_43 = arith.constant 0 : index
    %148 = vector.load %arg2[%c0_42, %c0_43] : memref<32x128xf32, #tpu.memory_space<vmem>>, vector<32x128xf32>
    %cst_44 = arith.constant dense<0.000000e+00> : vector<8x128xf32>
    %149 = tpu.matmul %143, %148, %cst_44 {dimension_numbers = #tpu.dot_dimension_numbers<[1], [0], [0], [1], [0, 0, 1, 1], [], []>} : vector<8x32xf32>, vector<32x128xf32>, vector<8x128xf32> -> vector<8x128xf32>
    %150 = arith.addf %147, %149 : vector<8x128xf32>
    %151 = vector.extract_strided_slice %150 {offsets = [0, 0], sizes = [8, 32], strides = [1, 1]} : vector<8x128xf32> to vector<8x32xf32>
    %152 = arith.negf %151 : vector<8x32xf32>
    %153 = math.exp %152 : vector<8x32xf32>
    %cst_45 = arith.constant 1.000000e+00 : f32
    %154 = vector.broadcast %cst_45 : f32 to vector<8x32xf32>
    %155 = arith.addf %154, %153 : vector<8x32xf32>
    %156 = arith.divf %154, %155 : vector<8x32xf32>
    %157 = vector.extract_strided_slice %150 {offsets = [0, 32], sizes = [8, 32], strides = [1, 1]} : vector<8x128xf32> to vector<8x32xf32>
    %158 = arith.negf %157 : vector<8x32xf32>
    %159 = math.exp %158 : vector<8x32xf32>
    %cst_46 = arith.constant 1.000000e+00 : f32
    %160 = vector.broadcast %cst_46 : f32 to vector<8x32xf32>
    %161 = arith.addf %160, %159 : vector<8x32xf32>
    %162 = arith.divf %160, %161 : vector<8x32xf32>
    %163 = vector.extract_strided_slice %147 {offsets = [0, 64], sizes = [8, 32], strides = [1, 1]} : vector<8x128xf32> to vector<8x32xf32>
    %164 = vector.extract_strided_slice %149 {offsets = [0, 64], sizes = [8, 32], strides = [1, 1]} : vector<8x128xf32> to vector<8x32xf32>
    %165 = vector.broadcast %7 : vector<1x32xf32> to vector<8x32xf32>
    %166 = arith.addf %164, %165 : vector<8x32xf32>
    %167 = arith.mulf %156, %166 : vector<8x32xf32>
    %168 = arith.addf %163, %167 : vector<8x32xf32>
    %169 = math.tanh %168 : vector<8x32xf32>
    %170 = arith.subf %143, %169 : vector<8x32xf32>
    %171 = arith.mulf %162, %170 : vector<8x32xf32>
    %172 = arith.addf %169, %171 : vector<8x32xf32>
    %c6_i32 = arith.constant 6 : i32
    %c8_i32_47 = arith.constant 8 : i32
    %173 = arith.muli %c6_i32, %c8_i32_47 : i32
    %174 = tpu.assume_multiple %173, 8 : i32
    %175 = arith.index_cast %174 : i32 to index
    %c0_48 = arith.constant 0 : index
    %176 = vector.load %arg6[%175, %c0_48] : memref<64x128xf32, #tpu.memory_space<vmem>>, vector<8x128xf32>
    %c0_49 = arith.constant 0 : index
    %c0_50 = arith.constant 0 : index
    %177 = vector.load %arg2[%c0_49, %c0_50] : memref<32x128xf32, #tpu.memory_space<vmem>>, vector<32x128xf32>
    %cst_51 = arith.constant dense<0.000000e+00> : vector<8x128xf32>
    %178 = tpu.matmul %172, %177, %cst_51 {dimension_numbers = #tpu.dot_dimension_numbers<[1], [0], [0], [1], [0, 0, 1, 1], [], []>} : vector<8x32xf32>, vector<32x128xf32>, vector<8x128xf32> -> vector<8x128xf32>
    %179 = arith.addf %176, %178 : vector<8x128xf32>
    %180 = vector.extract_strided_slice %179 {offsets = [0, 0], sizes = [8, 32], strides = [1, 1]} : vector<8x128xf32> to vector<8x32xf32>
    %181 = arith.negf %180 : vector<8x32xf32>
    %182 = math.exp %181 : vector<8x32xf32>
    %cst_52 = arith.constant 1.000000e+00 : f32
    %183 = vector.broadcast %cst_52 : f32 to vector<8x32xf32>
    %184 = arith.addf %183, %182 : vector<8x32xf32>
    %185 = arith.divf %183, %184 : vector<8x32xf32>
    %186 = vector.extract_strided_slice %179 {offsets = [0, 32], sizes = [8, 32], strides = [1, 1]} : vector<8x128xf32> to vector<8x32xf32>
    %187 = arith.negf %186 : vector<8x32xf32>
    %188 = math.exp %187 : vector<8x32xf32>
    %cst_53 = arith.constant 1.000000e+00 : f32
    %189 = vector.broadcast %cst_53 : f32 to vector<8x32xf32>
    %190 = arith.addf %189, %188 : vector<8x32xf32>
    %191 = arith.divf %189, %190 : vector<8x32xf32>
    %192 = vector.extract_strided_slice %176 {offsets = [0, 64], sizes = [8, 32], strides = [1, 1]} : vector<8x128xf32> to vector<8x32xf32>
    %193 = vector.extract_strided_slice %178 {offsets = [0, 64], sizes = [8, 32], strides = [1, 1]} : vector<8x128xf32> to vector<8x32xf32>
    %194 = vector.broadcast %7 : vector<1x32xf32> to vector<8x32xf32>
    %195 = arith.addf %193, %194 : vector<8x32xf32>
    %196 = arith.mulf %185, %195 : vector<8x32xf32>
    %197 = arith.addf %192, %196 : vector<8x32xf32>
    %198 = math.tanh %197 : vector<8x32xf32>
    %199 = arith.subf %172, %198 : vector<8x32xf32>
    %200 = arith.mulf %191, %199 : vector<8x32xf32>
    %201 = arith.addf %198, %200 : vector<8x32xf32>
    %c7_i32 = arith.constant 7 : i32
    %c8_i32_54 = arith.constant 8 : i32
    %202 = arith.muli %c7_i32, %c8_i32_54 : i32
    %203 = tpu.assume_multiple %202, 8 : i32
    %204 = arith.index_cast %203 : i32 to index
    %c0_55 = arith.constant 0 : index
    %205 = vector.load %arg6[%204, %c0_55] : memref<64x128xf32, #tpu.memory_space<vmem>>, vector<8x128xf32>
    %c0_56 = arith.constant 0 : index
    %c0_57 = arith.constant 0 : index
    %206 = vector.load %arg2[%c0_56, %c0_57] : memref<32x128xf32, #tpu.memory_space<vmem>>, vector<32x128xf32>
    %cst_58 = arith.constant dense<0.000000e+00> : vector<8x128xf32>
    %207 = tpu.matmul %201, %206, %cst_58 {dimension_numbers = #tpu.dot_dimension_numbers<[1], [0], [0], [1], [0, 0, 1, 1], [], []>} : vector<8x32xf32>, vector<32x128xf32>, vector<8x128xf32> -> vector<8x128xf32>
    %208 = arith.addf %205, %207 : vector<8x128xf32>
    %209 = vector.extract_strided_slice %208 {offsets = [0, 0], sizes = [8, 32], strides = [1, 1]} : vector<8x128xf32> to vector<8x32xf32>
    %210 = arith.negf %209 : vector<8x32xf32>
    %211 = math.exp %210 : vector<8x32xf32>
    %cst_59 = arith.constant 1.000000e+00 : f32
    %212 = vector.broadcast %cst_59 : f32 to vector<8x32xf32>
    %213 = arith.addf %212, %211 : vector<8x32xf32>
    %214 = arith.divf %212, %213 : vector<8x32xf32>
    %215 = vector.extract_strided_slice %208 {offsets = [0, 32], sizes = [8, 32], strides = [1, 1]} : vector<8x128xf32> to vector<8x32xf32>
    %216 = arith.negf %215 : vector<8x32xf32>
    %217 = math.exp %216 : vector<8x32xf32>
    %cst_60 = arith.constant 1.000000e+00 : f32
    %218 = vector.broadcast %cst_60 : f32 to vector<8x32xf32>
    %219 = arith.addf %218, %217 : vector<8x32xf32>
    %220 = arith.divf %218, %219 : vector<8x32xf32>
    %221 = vector.extract_strided_slice %205 {offsets = [0, 64], sizes = [8, 32], strides = [1, 1]} : vector<8x128xf32> to vector<8x32xf32>
    %222 = vector.extract_strided_slice %207 {offsets = [0, 64], sizes = [8, 32], strides = [1, 1]} : vector<8x128xf32> to vector<8x32xf32>
    %223 = vector.broadcast %7 : vector<1x32xf32> to vector<8x32xf32>
    %224 = arith.addf %222, %223 : vector<8x32xf32>
    %225 = arith.mulf %214, %224 : vector<8x32xf32>
    %226 = arith.addf %221, %225 : vector<8x32xf32>
    %227 = math.tanh %226 : vector<8x32xf32>
    %228 = arith.subf %201, %227 : vector<8x32xf32>
    %229 = arith.mulf %220, %228 : vector<8x32xf32>
    %230 = arith.addf %227, %229 : vector<8x32xf32>
    %c7_i32_61 = arith.constant 7 : i32
    %c0_62 = arith.constant 0 : index
    %c0_63 = arith.constant 0 : index
    %231 = vector.load %arg5[%c0_62, %c0_63] : memref<8x32xf32, #tpu.memory_space<vmem>>, vector<8x32xf32>
    tpu.vector_store %arg5[%c0_62, %c0_63], %230 {strides = array<i32>} : memref<8x32xf32, #tpu.memory_space<vmem>>, vector<8x32xf32>,
    return
  }
}

</mosaic_0001>

<bundles_post_ra>
// kernel: question_embedding_forward.1
= control target key start
LH: loop header
LB: loop body
LE: loop exit
PB: predicated region body
PF: predicated region fallthrough
CT: control target
= control target key end

     0   :  { %vm39_vm0 = vcmask 261120   ;;  %s1246_s8 = smov 64   ;;  %v1248_v21 = vmov 0.0|0.0   ;;  %vm1249_vm1 = vmmov 0   ;;  %v1250_v25 = vmov 0.0   ;;  %s1469_s1 = inlined_call_operand.vmem [shape: f32[32,128], index: 1, kind: input, shape index: {}]   ;;  %s1470_s0 = inlined_call_operand.vmem [shape: f32[64,32], index: 0, kind: input, shape index: {}]   ;;  %s1471_s3 = inlined_call_operand.vmem [shape: f32[1,128], index: 3, kind: input, shape index: {}]   ;;  %s1472_s4 = inlined_call_operand.vmem [shape: f32[1,32], index: 4, kind: input, shape index: {}]   ;;  %s1473_s2 = inlined_call_operand.vmem [shape: f32[32,128], index: 2, kind: input, shape index: {}]   ;;  %s1474_s5 = inlined_call_operand.vmem [shape: f32[8,32], index: 5, kind: output, shape index: {}]  }
   0x1   :  { %v28_v0 = vld [vmem:[%s1469_s1] sm:$0xff]  ;;  %v29_v1 = vld [vmem:[%s1469_s1 + $0x8] sm:$0xff]  ;;  %v30_v2 = vld [vmem:[%s1469_s1 + $0x10] sm:$0xff]  ;;  %1150 = vmatprep.subr.bf16.mxu1 %v1248_v21  ;;  %1073 = vmatprep.mubr.msk.f32.mxu1 %vm1249_vm1, %v1250_v25 }
   0x2   :  { %v1142_v3 = vpack.c.bf16 %v29_v1, %v28_v0  ;;  %v31_v4 = vld [vmem:[%s1469_s1 + $0x18] sm:$0xff]  ;;  %v20_v5 = vld [vmem:[%s1470_s0] sm:$0xff]  ;;  %v21_v7 = vld [vmem:[%s1470_s0 + $0x8] sm:$0xff] }
   0x3   :  { %v1146_v6 = vpack.c.bf16 %v31_v4, %v30_v2  ;;  %1053 = vmatprep.mubr.msk.f32.mxu0 %vm39_vm0, %v20_v5  ;;  %v1305_v8 = vld [vmem:[%s1471_s3] ss:$0 sm:$0xff]  ;;  %s1247_s3 = smov 96   ;;  %v211_v23 = vld [vmem:[%s1473_s2 + $0x8] sm:$0xff]  ;;  %v212_v24 = vld [vmem:[%s1473_s2 + $0x10] sm:$0xff] }
   0x4   :  { %1143 = vmatprep.subr.bf16.mxu0 %v1142_v3  ;;  %v983_v15 = vld [vmem:[%s1472_s4] ss:$0 sm:$0xff]  ;;  %v213_v27 = vld [vmem:[%s1473_s2 + $0x18] sm:$0xff]  ;;  %v22_v50 = vld [vmem:[%s1470_s0 + $0x10] sm:$0xff] }
   0x5   :  { %1145 = vmatpush3.bf16.msra.mxu0 %v1142_v3  ;;  %v210_v22 = vld [vmem:[%s1473_s2] sm:$0xff]  ;;  %v1333_v28 = vpack.c.bf16 %v213_v27, %v212_v24  ;;  %s1251_s2 = smov 32   ;;  %v23_v51 = vld [vmem:[%s1470_s0 + $0x18] sm:$0xff] }
   0x6   :  { %1147 = vmatprep.subr.bf16.mxu0 %v1146_v6  ;;  %v1326_v26 = vpack.c.bf16 %v211_v23, %v210_v22 }
   0x8   :  { %1152 = vmatpush3.bf16.msra.mxu1 %v1326_v26 }
   0x9   :  { %1149 = vmatpush3.bf16.msra.mxu0 %v1146_v6  ;;  %1153 = vmatprep.subr.bf16.mxu1 %v1248_v21 }
   0xa   :  { %1162 = vmatprep.subr.bf16.mxu0 %v1248_v21 }
   0xc   :  { %1054 = vmatmul.mubr.msk.f32.vlgmr.msra.gmra.mrb[0].mxu0 %vm39_vm0, %v21_v7  ;;  %1155 = vmatpush3.bf16.msra.mxu1 %v1333_v28 }
   0xd   :  { %1164 = vmatpush3.bf16.msra.mxu0 %v1326_v26  ;;  %1156 = vmatprep.subr.bf16.mxu1 %v1248_v21 }
   0xe   :  { %1165 = vmatprep.subr.bf16.mxu0 %v1248_v21  ;;  %1056 = vmatprep.mubr.msk.f32.mxu0 %vm39_vm0, %v22_v50 }
  0x10   :  { %1057 = vmatmul.mubr.msk.f32.gmra.mrb[2].mxu0 %vm39_vm0, %v23_v51 }
  0x11   :  { %1167 = vmatpush3.bf16.msra.mxu0 %v1333_v28 }
  0x12   :  { %1174 = vmatprep.subr.bf16.mxu0 %v1248_v21 }
  0xdf   :  { %v1055_v9 = vpop.f32.mrb[0].mxu0 }
  0xe0   :  { %v130_v10 = vpop.f32.mrb[1].mxu0  ;;  %v136_v38 = vadd.f32 %v1055_v9, %v1305_v8 }
  0xe1   :  { %v131_v11 = vadd.f32 %v1305_v8, %v130_v10 }
  0xe3   :  { %v982_v12 = vmul.f32 -1.442695, %v131_v11  ;;  %v1058_v56 = vpop.f32.mrb[2].mxu0 }
  0xe4   :  { %v140_v57 = vpop.f32.mrb[3].mxu0 }
  0xe5   :  { %1198 = vpow2.f32 %v982_v12  ;;  %v141_v62 = vadd.f32 %v1305_v8, %v140_v57  ;;  %v25_v12 = vld [vmem:[%s1470_s0 + $0x28] sm:$0xff] }
  0xef   :  { %v1199_v13 = vpop.eup %1198 }
  0xf0   :  { %v182_v14 = vadd.f32 1.0, %v1199_v13  ;;  %v26_v13 = vld [vmem:[%s1470_s0 + $0x30] sm:$0xff] }
  0xf2   :  { %1200 = vrcp.f32 %v182_v14  ;;  %v27_v14 = vld [vmem:[%s1470_s0 + $0x38] sm:$0xff] }
  0xfc   :  { %v1201_v16 = vpop.eup %1200 }
  0xfd   :  { %v191_v17 = vmul.f32 %v1201_v16, %v983_v15 }
  0xff   :  { %193 = vrot.lane.b32.xlu0 %v191_v17, %s1246_s8 }
 0x171   :  { %v194_v18 = vpop.permute.xlu0 %193 }
 0x172   :  { %v196_v19 = vadd.f32 %v194_v18, %v131_v11  ;;  %v24_v11 = vld [vmem:[%s1470_s0 + $0x20] sm:$0xff] }
 0x173   :  { %1059 = vmatprep.mubr.msk.f32.mxu0 %vm39_vm0, %v24_v11 }
 0x174   :  { %1202 = vtanh.f32 %v196_v19  ;;  %1060 = vmatmul.mubr.msk.f32.gmra.mrb[4].mxu0 %vm39_vm0, %v25_v12 }
 0x175   :  { %1062 = vmatprep.mubr.msk.f32.mxu0 %vm39_vm0, %v26_v13 }
 0x178   :  { %1063 = vmatmul.mubr.msk.f32.gmra.mrb[6].mxu0 %vm39_vm0, %v27_v14 }
 0x179   :  { %1095 = vmatprep.mubr.msk.f32.mxu0 %vm1249_vm1, %v1250_v25 }
 0x17e   :  { %v1203_v20 = vpop.eup %1202 }
 0x17f   :  { %199 = vrot.lane.b32.xlu0 %v1203_v20, %s1247_s3 }
 0x183   :  { %296 = vrot.lane.b32.xlu0 %v983_v15, %s1246_s8 }
 0x1f1   :  { %v200_v29 = vpop.permute.xlu0 %199 }
 0x1f2   :  { %v202_v30 = vmul.f32 %v1201_v16, %v200_v29 }
 0x1f4   :  { %204 = vrot.lane.b32.xlu1 %v202_v30, %s1251_s2 }
 0x1f5   :  { %v1351_v34 = vpop.permute.xlu0 %296 }
 0x247   :  { %v1400_v19 = vpop.f32.mrb[4].mxu0 }
 0x266   :  { %v205_v31 = vpop.permute.xlu1 %204 }
 0x267   :  { %v207_v32 = vsub.f32 %v1203_v20, %v205_v31  ;;  %v150_v20 = vpop.f32.mrb[5].mxu0  ;;  %v146_v31 = vadd.f32 %v1058_v56, %v1305_v8 }
 0x268   :  { %v1402_v22 = vpop.f32.mrb[6].mxu0 }
 0x269   :  { %215 = vrot.lane.b32.xlu1 %v207_v32, %s1246_s8  ;;  %v1404_v23 = vpop.f32.mrb[7].mxu0 }
 0x2db   :  { %v216_v33 = vpop.permute.xlu1 %215 }
 0x2dc   :  { %1074 = vmatmul.mubr.msk.f32.vlgmr.msra.gmra.mrb[0].mxu1 %vm39_vm0, %v216_v33 }
 0x2dd   :  { %1158 = vmatpush3.bf16.msra.mxu1 %v1326_v26  ;;  %1084 = vmatprep.mubr.msk.f32.mxu1 %vm1249_vm1, %v1250_v25 }
 0x2de   :  { %1159 = vmatprep.subr.bf16.mxu1 %v1248_v21 }
 0x2e1   :  { %1161 = vmatpush3.bf16.msra.mxu1 %v1333_v28 }
 0x2e2   :  { %1168 = vmatprep.subr.bf16.mxu1 %v1248_v21 }
 0x3af   :  { %v285_v35 = vpop.f32.mrb[0].mxu1 }
 0x3b0   :  { %v1075_v36 = vpop.f32.mrb[1].mxu1  ;;  %v299_v37 = vadd.f32 %v1351_v34, %v285_v35  ;;  %v289_v39 = vadd.f32 %v285_v35, %v136_v38 }
 0x3b2   :  { %301 = vrot.lane.b32.xlu1 %v299_v37, %s1246_s8  ;;  %v985_v40 = vmul.f32 -1.442695, %v289_v39 }
 0x3b4   :  { %1204 = vpow2.f32 %v985_v40 }
 0x3be   :  { %v1205_v41 = vpop.eup %1204 }
 0x3bf   :  { %v293_v42 = vadd.f32 1.0, %v1205_v41 }
 0x3c1   :  { %1206 = vrcp.f32 %v293_v42 }
 0x3cb   :  { %v1207_v43 = vpop.eup %1206 }
 0x424   :  { %v302_v44 = vpop.permute.xlu1 %301 }
 0x425   :  { %v304_v45 = vmul.f32 %v1207_v43, %v302_v44 }
 0x427   :  { %306 = vrot.lane.b32.xlu0 %v304_v45, %s1246_s8 }
 0x499   :  { %v307_v46 = vpop.permute.xlu0 %306 }
 0x49a   :  { %v309_v47 = vadd.f32 %v307_v46, %v136_v38 }
 0x49c   :  { %1208 = vtanh.f32 %v309_v47 }
 0x4a6   :  { %v1209_v48 = vpop.eup %1208 }
 0x4a7   :  { %v311_v49 = vsub.f32 %v207_v32, %v1209_v48 }
 0x4a9   :  { %313 = vrot.lane.b32.xlu1 %v311_v49, %s1247_s3 }
 0x51b   :  { %v314_v52 = vpop.permute.xlu1 %313 }
 0x51c   :  { %v316_v53 = vmul.f32 %v1207_v43, %v314_v52  ;;  %v151_v52 = vadd.f32 %v1305_v8, %v150_v20 }
 0x51e   :  { %318 = vrot.lane.b32.xlu0 %v316_v53, %s1251_s2 }
 0x590   :  { %v319_v54 = vpop.permute.xlu0 %318 }
 0x591   :  { %v321_v55 = vadd.f32 %v1209_v48, %v319_v54 }
 0x593   :  { %325 = vrot.lane.b32.xlu1 %v321_v55, %s1246_s8 }
 0x605   :  { %v326_v58 = vpop.permute.xlu1 %325 }
 0x606   :  { %1085 = vmatmul.mubr.msk.f32.vlgmr.msra.gmra.mrb[2].mxu1 %vm39_vm0, %v326_v58 }
 0x607   :  { %1170 = vmatpush3.bf16.msra.mxu1 %v1326_v26  ;;  %1106 = vmatprep.mubr.msk.f32.mxu1 %vm1249_vm1, %v1250_v25 }
 0x608   :  { %1171 = vmatprep.subr.bf16.mxu1 %v1248_v21 }
 0x60b   :  { %1173 = vmatpush3.bf16.msra.mxu1 %v1333_v28 }
 0x60c   :  { %1180 = vmatprep.subr.bf16.mxu1 %v1248_v21 }
 0x6d9   :  { %v395_v59 = vpop.f32.mrb[2].mxu1 }
 0x6da   :  { %v406_v60 = vadd.f32 %v395_v59, %v1351_v34  ;;  %v1086_v61 = vpop.f32.mrb[3].mxu1  ;;  %v399_v63 = vadd.f32 %v395_v59, %v141_v62 }
 0x6dc   :  { %408 = vrot.lane.b32.xlu0 %v406_v60, %s1246_s8  ;;  %v987_v0 = vmul.f32 -1.442695, %v399_v63 }
 0x6de   :  { %1210 = vpow2.f32 %v987_v0 }
 0x6e8   :  { %v1211_v1 = vpop.eup %1210 }
 0x6e9   :  { %v403_v2 = vadd.f32 1.0, %v1211_v1 }
 0x6eb   :  { %1212 = vrcp.f32 %v403_v2 }
 0x6f5   :  { %v1213_v3 = vpop.eup %1212 }
 0x74e   :  { %v409_v4 = vpop.permute.xlu0 %408 }
 0x74f   :  { %v411_v5 = vmul.f32 %v1213_v3, %v409_v4 }
 0x751   :  { %413 = vrot.lane.b32.xlu1 %v411_v5, %s1246_s8 }
 0x7c3   :  { %v414_v6 = vpop.permute.xlu1 %413 }
 0x7c4   :  { %v416_v7 = vadd.f32 %v414_v6, %v141_v62 }
 0x7c6   :  { %1214 = vtanh.f32 %v416_v7 }
 0x7d0   :  { %v1215_v9 = vpop.eup %1214 }
 0x7d1   :  { %v418_v10 = vsub.f32 %v321_v55, %v1215_v9 }
 0x7d3   :  { %420 = vrot.lane.b32.xlu0 %v418_v10, %s1247_s3 }
 0x845   :  { %v421_v15 = vpop.permute.xlu0 %420 }
 0x846   :  { %v423_v16 = vmul.f32 %v1213_v3, %v421_v15 }
 0x848   :  { %425 = vrot.lane.b32.xlu1 %v423_v16, %s1251_s2 }
 0x8ba   :  { %v426_v17 = vpop.permute.xlu1 %425 }
 0x8bb   :  { %v428_v18 = vadd.f32 %v1215_v9, %v426_v17  ;;  %v156_v9 = vadd.f32 %v1400_v19, %v1305_v8 }
 0x8bd   :  { %432 = vrot.lane.b32.xlu0 %v428_v18, %s1246_s8 }
 0x92f   :  { %v433_v24 = vpop.permute.xlu0 %432 }
 0x930   :  { %1096 = vmatmul.mubr.msk.f32.vlgmr.msra.gmra.mrb[8].mxu0 %vm39_vm0, %v433_v24 }
 0x931   :  { %1176 = vmatpush3.bf16.msra.mxu0 %v1326_v26  ;;  %1117 = vmatprep.mubr.msk.f32.mxu0 %vm1249_vm1, %v1250_v25 }
 0x932   :  { %1177 = vmatprep.subr.bf16.mxu0 %v1248_v21 }
 0x935   :  { %1179 = vmatpush3.bf16.msra.mxu0 %v1333_v28 }
 0x936   :  { %1186 = vmatprep.subr.bf16.mxu0 %v1248_v21 }
 0xa03   :  { %v502_v27 = vpop.f32.mrb[8].mxu0 }
 0xa04   :  { %v513_v29 = vadd.f32 %v502_v27, %v1351_v34  ;;  %v1097_v30 = vpop.f32.mrb[9].mxu0  ;;  %v506_v32 = vadd.f32 %v502_v27, %v146_v31 }
 0xa06   :  { %515 = vrot.lane.b32.xlu1 %v513_v29, %s1246_s8  ;;  %v989_v33 = vmul.f32 -1.442695, %v506_v32 }
 0xa08   :  { %1216 = vpow2.f32 %v989_v33 }
 0xa12   :  { %v1217_v35 = vpop.eup %1216 }
 0xa13   :  { %v510_v36 = vadd.f32 1.0, %v1217_v35 }
 0xa15   :  { %1218 = vrcp.f32 %v510_v36 }
 0xa1f   :  { %v1219_v37 = vpop.eup %1218 }
 0xa78   :  { %v516_v38 = vpop.permute.xlu1 %515 }
 0xa79   :  { %v518_v39 = vmul.f32 %v1219_v37, %v516_v38 }
 0xa7b   :  { %520 = vrot.lane.b32.xlu0 %v518_v39, %s1246_s8 }
 0xaed   :  { %v521_v40 = vpop.permute.xlu0 %520 }
 0xaee   :  { %v523_v41 = vadd.f32 %v521_v40, %v146_v31  ;;  %v161_v31 = vadd.f32 %v1305_v8, %v1404_v23 }
 0xaf0   :  { %1220 = vtanh.f32 %v523_v41 }
 0xafa   :  { %v1221_v42 = vpop.eup %1220 }
 0xafb   :  { %v525_v43 = vsub.f32 %v428_v18, %v1221_v42 }
 0xafd   :  { %527 = vrot.lane.b32.xlu1 %v525_v43, %s1247_s3 }
 0xb6f   :  { %v528_v44 = vpop.permute.xlu1 %527 }
 0xb70   :  { %v530_v45 = vmul.f32 %v1219_v37, %v528_v44 }
 0xb72   :  { %532 = vrot.lane.b32.xlu0 %v530_v45, %s1251_s2 }
 0xbe4   :  { %v533_v46 = vpop.permute.xlu0 %532 }
 0xbe5   :  { %v535_v47 = vadd.f32 %v1221_v42, %v533_v46 }
 0xbe7   :  { %539 = vrot.lane.b32.xlu1 %v535_v47, %s1246_s8 }
 0xc59   :  { %v540_v48 = vpop.permute.xlu1 %539 }
 0xc5a   :  { %1107 = vmatmul.mubr.msk.f32.vlgmr.msra.gmra.mrb[4].mxu1 %vm39_vm0, %v540_v48 }
 0xc5b   :  { %1182 = vmatpush3.bf16.msra.mxu1 %v1326_v26  ;;  %1128 = vmatprep.mubr.msk.f32.mxu1 %vm1249_vm1, %v1250_v25 }
 0xc5c   :  { %1183 = vmatprep.subr.bf16.mxu1 %v1248_v21 }
 0xc5f   :  { %1185 = vmatpush3.bf16.msra.mxu1 %v1333_v28 }
 0xd2d   :  { %v609_v49 = vpop.f32.mrb[4].mxu1 }
 0xd2e   :  { %v620_v50 = vadd.f32 %v609_v49, %v1351_v34  ;;  %v1108_v51 = vpop.f32.mrb[5].mxu1  ;;  %v613_v53 = vadd.f32 %v609_v49, %v151_v52 }
 0xd2f   :  { %v166_v51 = vadd.f32 %v1402_v22, %v1305_v8 }
 0xd30   :  { %622 = vrot.lane.b32.xlu0 %v620_v50, %s1246_s8  ;;  %v991_v54 = vmul.f32 -1.442695, %v613_v53 }
 0xd32   :  { %1222 = vpow2.f32 %v991_v54 }
 0xd3c   :  { %v1223_v55 = vpop.eup %1222 }
 0xd3d   :  { %v617_v56 = vadd.f32 1.0, %v1223_v55 }
 0xd3f   :  { %1224 = vrcp.f32 %v617_v56 }
 0xd49   :  { %v1225_v57 = vpop.eup %1224 }
 0xda2   :  { %v623_v58 = vpop.permute.xlu0 %622 }
 0xda3   :  { %v625_v59 = vmul.f32 %v1225_v57, %v623_v58 }
 0xda5   :  { %627 = vrot.lane.b32.xlu1 %v625_v59, %s1246_s8 }
 0xe17   :  { %v628_v60 = vpop.permute.xlu1 %627 }
 0xe18   :  { %v630_v61 = vadd.f32 %v628_v60, %v151_v52 }
 0xe1a   :  { %1226 = vtanh.f32 %v630_v61 }
 0xe24   :  { %v1227_v62 = vpop.eup %1226 }
 0xe25   :  { %v632_v63 = vsub.f32 %v535_v47, %v1227_v62 }
 0xe27   :  { %634 = vrot.lane.b32.xlu0 %v632_v63, %s1247_s3 }
 0xe99   :  { %v635_v0 = vpop.permute.xlu0 %634 }
 0xe9a   :  { %v637_v1 = vmul.f32 %v1225_v57, %v635_v0 }
 0xe9c   :  { %639 = vrot.lane.b32.xlu1 %v637_v1, %s1251_s2 }
 0xf0e   :  { %v640_v2 = vpop.permute.xlu1 %639 }
 0xf0f   :  { %v642_v3 = vadd.f32 %v1227_v62, %v640_v2 }
 0xf11   :  { %646 = vrot.lane.b32.xlu0 %v642_v3, %s1246_s8 }
 0xf83   :  { %v647_v4 = vpop.permute.xlu0 %646 }
 0xf84   :  { %1118 = vmatmul.mubr.msk.f32.vlgmr.msra.gmra.mrb[10].mxu0 %vm39_vm0, %v647_v4 }
 0xf85   :  { %1188 = vmatpush3.bf16.msra.mxu0 %v1326_v26  ;;  %1139 = vmatprep.mubr.msk.f32.mxu0 %vm1249_vm1, %v1250_v25 }
 0xf86   :  { %1189 = vmatprep.subr.bf16.mxu0 %v1248_v21 }
 0xf89   :  { %1191 = vmatpush3.bf16.msra.mxu0 %v1333_v28 }
0x1057   :  { %v716_v5 = vpop.f32.mrb[10].mxu0 }
0x1058   :  { %v727_v6 = vadd.f32 %v716_v5, %v1351_v34  ;;  %v1119_v7 = vpop.f32.mrb[11].mxu0  ;;  %v720_v10 = vadd.f32 %v716_v5, %v156_v9 }
0x105a   :  { %729 = vrot.lane.b32.xlu1 %v727_v6, %s1246_s8  ;;  %v993_v11 = vmul.f32 -1.442695, %v720_v10 }
0x105c   :  { %1228 = vpow2.f32 %v993_v11 }
0x1066   :  { %v1229_v26 = vpop.eup %1228 }
0x1067   :  { %v724_v12 = vadd.f32 1.0, %v1229_v26 }
0x1069   :  { %1230 = vrcp.f32 %v724_v12 }
0x1073   :  { %v1231_v25 = vpop.eup %1230 }
0x10cc   :  { %v730_v13 = vpop.permute.xlu1 %729 }
0x10cd   :  { %v732_v21 = vmul.f32 %v1231_v25, %v730_v13 }
0x10cf   :  { %734 = vrot.lane.b32.xlu0 %v732_v21, %s1246_s8 }
0x1141   :  { %v735_v28 = vpop.permute.xlu0 %734 }
0x1142   :  { %v737_v14 = vadd.f32 %v735_v28, %v156_v9 }
0x1144   :  { %1232 = vtanh.f32 %v737_v14 }
0x114e   :  { %v1233_v15 = vpop.eup %1232 }
0x114f   :  { %v739_v16 = vsub.f32 %v642_v3, %v1233_v15 }
0x1151   :  { %741 = vrot.lane.b32.xlu1 %v739_v16, %s1247_s3 }
0x11c3   :  { %v742_v17 = vpop.permute.xlu1 %741 }
0x11c4   :  { %v744_v18 = vmul.f32 %v1231_v25, %v742_v17 }
0x11c6   :  { %746 = vrot.lane.b32.xlu0 %v744_v18, %s1251_s2 }
0x1238   :  { %v747_v19 = vpop.permute.xlu0 %746 }
0x1239   :  { %v749_v20 = vadd.f32 %v1233_v15, %v747_v19 }
0x123b   :  { %753 = vrot.lane.b32.xlu1 %v749_v20, %s1246_s8 }
0x12ad   :  { %v754_v24 = vpop.permute.xlu1 %753 }
0x12ae   :  { %1129 = vmatmul.mubr.msk.f32.vlgmr.msra.gmra.mrb[6].mxu1 %vm39_vm0, %v754_v24 }
0x1381   :  { %v823_v27 = vpop.f32.mrb[6].mxu1 }
0x1382   :  { %v834_v29 = vadd.f32 %v823_v27, %v1351_v34  ;;  %v1130_v30 = vpop.f32.mrb[7].mxu1  ;;  %v827_v32 = vadd.f32 %v823_v27, %v161_v31 }
0x1384   :  { %836 = vrot.lane.b32.xlu0 %v834_v29, %s1246_s8  ;;  %v995_v33 = vmul.f32 -1.442695, %v827_v32 }
0x1386   :  { %1234 = vpow2.f32 %v995_v33 }
0x1390   :  { %v1235_v35 = vpop.eup %1234 }
0x1391   :  { %v831_v36 = vadd.f32 1.0, %v1235_v35 }
0x1393   :  { %1236 = vrcp.f32 %v831_v36 }
0x139d   :  { %v1237_v37 = vpop.eup %1236 }
0x13f6   :  { %v837_v38 = vpop.permute.xlu0 %836 }
0x13f7   :  { %v839_v39 = vmul.f32 %v1237_v37, %v837_v38 }
0x13f9   :  { %841 = vrot.lane.b32.xlu1 %v839_v39, %s1246_s8 }
0x146b   :  { %v842_v40 = vpop.permute.xlu1 %841 }
0x146c   :  { %v844_v41 = vadd.f32 %v842_v40, %v161_v31 }
0x146e   :  { %1238 = vtanh.f32 %v844_v41 }
0x1478   :  { %v1239_v42 = vpop.eup %1238 }
0x1479   :  { %v846_v43 = vsub.f32 %v749_v20, %v1239_v42 }
0x147b   :  { %848 = vrot.lane.b32.xlu0 %v846_v43, %s1247_s3 }
0x14ed   :  { %v849_v44 = vpop.permute.xlu0 %848 }
0x14ee   :  { %v851_v23 = vmul.f32 %v1237_v37, %v849_v44 }
0x14f0   :  { %853 = vrot.lane.b32.xlu1 %v851_v23, %s1251_s2 }
0x1562   :  { %v854_v45 = vpop.permute.xlu1 %853 }
0x1563   :  { %v856_v46 = vadd.f32 %v1239_v42, %v854_v45 }
0x1565   :  { %860 = vrot.lane.b32.xlu0 %v856_v46, %s1246_s8 }
0x15d7   :  { %v861_v47 = vpop.permute.xlu0 %860 }
0x15d8   :  { %1140 = vmatmul.mubr.msk.f32.vlgmr.msra.gmra.mrb[12].mxu0 %vm39_vm0, %v861_v47 }
0x16ab   :  { %v930_v48 = vpop.f32.mrb[12].mxu0 }
0x16ac   :  { %v941_v49 = vadd.f32 %v930_v48, %v1351_v34  ;;  %v1141_v50 = vpop.f32.mrb[13].mxu0  ;;  %v934_v52 = vadd.f32 %v930_v48, %v166_v51 }
0x16ae   :  { %943 = vrot.lane.b32.xlu1 %v941_v49, %s1246_s8  ;;  %v997_v53 = vmul.f32 -1.442695, %v934_v52 }
0x16b0   :  { %1240 = vpow2.f32 %v997_v53 }
0x16ba   :  { %v1241_v54 = vpop.eup %1240 }
0x16bb   :  { %v938_v55 = vadd.f32 1.0, %v1241_v54 }
0x16bd   :  { %1242 = vrcp.f32 %v938_v55 }
0x16c7   :  { %v1243_v56 = vpop.eup %1242 }
0x1720   :  { %v944_v57 = vpop.permute.xlu1 %943 }
0x1721   :  { %v946_v58 = vmul.f32 %v1243_v56, %v944_v57 }
0x1723   :  { %948 = vrot.lane.b32.xlu0 %v946_v58, %s1246_s8 }
0x1795   :  { %v949_v59 = vpop.permute.xlu0 %948 }
0x1796   :  { %v951_v60 = vadd.f32 %v949_v59, %v166_v51 }
0x1798   :  { %1244 = vtanh.f32 %v951_v60 }
0x17a2   :  { %v1245_v34 = vpop.eup %1244 }
0x17a3   :  { %v953_v61 = vsub.f32 %v856_v46, %v1245_v34 }
0x17a5   :  { %955 = vrot.lane.b32.xlu1 %v953_v61, %s1247_s3 }
0x1817   :  { %v956_v62 = vpop.permute.xlu1 %955 }
0x1818   :  { %v958_v8 = vmul.f32 %v1243_v56, %v956_v62 }
0x181a   :  { %960 = vrot.lane.b32.xlu0 %v958_v8, %s1251_s2 }
0x188c   :  { %v961_v22 = vpop.permute.xlu0 %960 }
0x188d   :  { %v963_v63 = vadd.f32 %v1245_v34, %v961_v22 }
0x188f   :  { %965 = vrot.lane.b32.xlu1 %v963_v63, %s1246_s8 }
0x1901   :  { %v966_v0 = vpop.permute.xlu1 %965 }
0x1902   :  { %968 = vst.msk [vmem:[%s1474_s5] sm:$0xff] %vm39_vm0, %v966_v0 }

</bundles_post_ra>
